<compile_context>
chip_gen: v6e
topology: v6e:2x2x1
jax: 0.10.0
libtpu: 0.0.40
codegen_flags: <defaults>
</compile_context>

<pallas_src>
import jax
import jax.numpy as jnp
from jax.experimental import pallas as pl
from jax.experimental.pallas import tpu as pltpu

K = 5
INPUT_SIZE = 14 * K + 8   # 78
HIDDEN = 128              # `size` in the PyTorch module
H2 = HIDDEN // 2          # 64
H3 = HIDDEN // 4          # 32
OUTPUT_SIZE = 8           # chosen output_size for this synthetic instance


def _mish(z):
    # mish(z) = z * tanh(softplus(z)) = z * n / (n + 2),  n = e*(e+2),  e = exp(z).
    # Clamping the exp argument at 20 is exact in f32 (ratio is already 1.0 there)
    # and prevents overflow for large z.
    e = jnp.exp(jnp.minimum(z, 20.0))
    n = e * (e + 2.0)                                 # = (1+e)^2 - 1, no cancellation
    # EUP-bound path -> approximate reciprocal (single vrcp push, no refinement).
    return z * n * pl.reciprocal(n + 2.0, approx=True)


def armynet_kernel(x_ref,
                   w1_ref, b1_ref,
                   w2_ref, b2_ref,
                   w3_ref, b3_ref,
                   w4_ref, b4_ref,
                   o_ref):
    # bf16 MXU operands, f32 accumulation, f32 biases / activations between layers.
    h = jnp.dot(x_ref[...], w1_ref[...],
                preferred_element_type=jnp.float32) + b1_ref[...]
    h = _mish(h)                                  # Dropout(0.5) -> identity (eval mode)

    h = jnp.dot(h.astype(jnp.bfloat16), w2_ref[...],
                preferred_element_type=jnp.float32) + b2_ref[...]
    h = _mish(h)                                  # Dropout(0.5) -> identity (eval mode)

    h = jnp.dot(h.astype(jnp.bfloat16), w3_ref[...],
                preferred_element_type=jnp.float32) + b3_ref[...]
    h = _mish(h)                                  # Dropout(0.5) -> identity (eval mode)

    h = jnp.dot(h.astype(jnp.bfloat16), w4_ref[...],
                preferred_element_type=jnp.float32) + b4_ref[...]
    o_ref[...] = jnp.tanh(h)


def _round_up(v, m):
    return ((v + m - 1) // m) * m


def _pick_batch_tile(b):
    if b >= 1024:
        return 512                                # deep M pipeline, amortize step overhead
    if b >= 32:
        # >=2 grid steps so both v7x TensorCores get work; 16-row (bf16 sublane) aligned.
        return min(512, _round_up(pl.cdiv(b, 2), 16))
    return _round_up(b, 16)                       # single whole-array step for tiny batches


def prepare_params(params):
    """One-time preprocessing (kept out of the per-call path): cast weights to the
    MXU-native bf16 operand format; biases stay f32 (added to the f32 accumulator)."""
    out = {}
    for i in range(1, 5):
        out[f"w{i}"] = params[f"w{i}"].astype(jnp.bfloat16)
        out[f"b{i}"] = params[f"b{i}"].astype(jnp.float32)
    return out


def armynet_forward(x, prepped):
    """x: (B, 78) float32.  prepped: output of prepare_params().  Returns (B, 8) f32."""
    B, F = x.shape
    assert F == INPUT_SIZE

    tile = _pick_batch_tile(B)
    Bp = _round_up(B, tile)

    xb = x.astype(jnp.bfloat16)
    if Bp != B:
        xb = jnp.pad(xb, ((0, Bp - B), (0, 0)))   # batch-only pad; fuses under jit

    def resident(arr):
        # Whole-array block, same block every grid step -> stays resident in VMEM.
        return pl.BlockSpec(arr.shape, lambda i: (0, 0))

    grid = (Bp // tile,)

    # Advisory cost hint for XLA's scheduler around this custom call (unpadded shapes).
    flops = 2 * Bp * (INPUT_SIZE * HIDDEN + HIDDEN * H2 + H2 * H3 + H3 * OUTPUT_SIZE)
    transcendentals = Bp * (2 * (HIDDEN + H2 + H3) + OUTPUT_SIZE)  # exp+rcp per mish, tanh out
    param_bytes = (2 * (INPUT_SIZE * HIDDEN + HIDDEN * H2 + H2 * H3 + H3 * OUTPUT_SIZE)
                   + 4 * (HIDDEN + H2 + H3 + OUTPUT_SIZE))
    bytes_accessed = Bp * (2 * INPUT_SIZE + 4 * OUTPUT_SIZE) + param_bytes

    out = pl.pallas_call(
        armynet_kernel,
        out_shape=jax.ShapeDtypeStruct((Bp, OUTPUT_SIZE), jnp.float32),
        grid_spec=pltpu.PrefetchScalarGridSpec(
            num_scalar_prefetch=0,
            grid=grid,
            in_specs=[
                pl.BlockSpec((tile, INPUT_SIZE), lambda i: (i, 0)),
                resident(prepped["w1"]), resident(prepped["b1"]),
                resident(prepped["w2"]), resident(prepped["b2"]),
                resident(prepped["w3"]), resident(prepped["b3"]),
                resident(prepped["w4"]), resident(prepped["b4"]),
            ],
            out_specs=pl.BlockSpec((tile, OUTPUT_SIZE), lambda i: (i, 0)),
        ),
        compiler_params=pltpu.CompilerParams(
            dimension_semantics=("parallel",),
        ),
        cost_estimate=pl.CostEstimate(
            flops=flops,
            transcendentals=transcendentals,
            bytes_accessed=bytes_accessed,
        ),
    )(xb,
      prepped["w1"], prepped["b1"],
      prepped["w2"], prepped["b2"],
      prepped["w3"], prepped["b3"],
      prepped["w4"], prepped["b4"])

    return out[:B]


def init_params(key):
    """Deterministic PyTorch-Linear-style init: U(-1/sqrt(fan_in), 1/sqrt(fan_in)).
    Weights stored transposed as (in_features, out_features); biases as (1, out)."""
    dims = [(INPUT_SIZE, HIDDEN), (HIDDEN, H2), (H2, H3), (H3, OUTPUT_SIZE)]
    params = {}
    for idx, (fin, fout) in enumerate(dims, start=1):
        key, kw, kb = jax.random.split(key, 3)
        bound = 1.0 / jnp.sqrt(jnp.float32(fin))
        params[f"w{idx}"] = jax.random.uniform(
            kw, (fin, fout), jnp.float32, minval=-bound, maxval=bound)
        params[f"b{idx}"] = jax.random.uniform(
            kb, (1, fout), jnp.float32, minval=-bound, maxval=bound)
    return params


def reference_forward(x, params):
    """Plain-JAX f32 reference of the same (eval-mode) forward pass, faithful to the
    spec: mish(z) = z * tanh(softplus(z))."""
    def mish_ref(z):
        return z * jnp.tanh(jnp.logaddexp(z, 0.0))
    h = x
    h = mish_ref(h @ params["w1"] + params["b1"])
    h = mish_ref(h @ params["w2"] + params["b2"])
    h = mish_ref(h @ params["w3"] + params["b3"])
    return jnp.tanh(h @ params["w4"] + params["b4"])


if __name__ == "__main__":
    key = jax.random.PRNGKey(0)
    key, kx = jax.random.split(key)

    batch = 8
    x = jax.random.normal(kx, (batch, INPUT_SIZE), jnp.float32)
    params = init_params(key)
    prepped = prepare_params(params)          # one-time bf16 weight cast

    fwd = jax.jit(armynet_forward)
    out = jax.block_until_ready(fwd(x, prepped))

    ref = reference_forward(x, params)
    assert out.shape == (batch, OUTPUT_SIZE)
    # bf16 MXU operands + approximate EUP reciprocal -> bf16-appropriate tolerance
    # (f32 accumulation keeps the error well inside this bound).
    assert jnp.allclose(out, ref, atol=3e-2, rtol=3e-2), "mismatch vs plain-JAX reference"

    print("KERNEL_OK")
</pallas_src>

<mosaic_0001>
module attributes {stable_mosaic.version = 11 : i64} {
  func.func @armynet_kernel(%arg0: i32, %arg1: memref<16x78xbf16, #tpu.memory_space<vmem>>, %arg2: memref<78x128xbf16, #tpu.memory_space<vmem>>, %arg3: memref<1x128xf32, #tpu.memory_space<vmem>>, %arg4: memref<128x64xbf16, #tpu.memory_space<vmem>>, %arg5: memref<1x64xf32, #tpu.memory_space<vmem>>, %arg6: memref<64x32xbf16, #tpu.memory_space<vmem>>, %arg7: memref<1x32xf32, #tpu.memory_space<vmem>>, %arg8: memref<32x8xbf16, #tpu.memory_space<vmem>>, %arg9: memref<1x8xf32, #tpu.memory_space<vmem>>, %arg10: memref<16x8xf32, #tpu.memory_space<vmem>>) attributes {dimension_semantics = [#tpu.dimension_semantics<parallel>], iteration_bounds = array<i64: 1>, scalar_prefetch = 0 : i64, scratch_operands = 0 : i64, tpu.core_type = #tpu.core_type<tc>, window_params = [{transform_indices = @transform_0, window_bounds = array<i64: 16, 78>}, {pipeline_mode = #tpu.pipeline_mode<synchronous>, transform_indices = @transform_1, window_bounds = array<i64: 78, 128>}, {pipeline_mode = #tpu.pipeline_mode<synchronous>, transform_indices = @transform_2, window_bounds = array<i64: 1, 128>}, {pipeline_mode = #tpu.pipeline_mode<synchronous>, transform_indices = @transform_3, window_bounds = array<i64: 128, 64>}, {pipeline_mode = #tpu.pipeline_mode<synchronous>, transform_indices = @transform_4, window_bounds = array<i64: 1, 64>}, {pipeline_mode = #tpu.pipeline_mode<synchronous>, transform_indices = @transform_5, window_bounds = array<i64: 64, 32>}, {pipeline_mode = #tpu.pipeline_mode<synchronous>, transform_indices = @transform_6, window_bounds = array<i64: 1, 32>}, {pipeline_mode = #tpu.pipeline_mode<synchronous>, transform_indices = @transform_7, window_bounds = array<i64: 32, 8>}, {pipeline_mode = #tpu.pipeline_mode<synchronous>, transform_indices = @transform_8, window_bounds = array<i64: 1, 8>}, {transform_indices = @transform_9, window_bounds = array<i64: 16, 8>}]} {
    %c0 = arith.constant 0 : index
    %c0_0 = arith.constant 0 : index
    %0 = vector.load %arg1[%c0, %c0_0] : memref<16x78xbf16, #tpu.memory_space<vmem>>, vector<16x78xbf16>
    %c0_1 = arith.constant 0 : index
    %c0_2 = arith.constant 0 : index
    %1 = vector.load %arg2[%c0_1, %c0_2] : memref<78x128xbf16, #tpu.memory_space<vmem>>, vector<78x128xbf16>
    %cst = arith.constant dense<0.000000e+00> : vector<16x128xf32>
    %2 = tpu.matmul %0, %1, %cst {dimension_numbers = #tpu.dot_dimension_numbers<[1], [0], [0], [1], [0, 0, 1, 1], [], []>} : vector<16x78xbf16>, vector<78x128xbf16>, vector<16x128xf32> -> vector<16x128xf32>
    %c0_3 = arith.constant 0 : index
    %c0_4 = arith.constant 0 : index
    %3 = vector.load %arg3[%c0_3, %c0_4] : memref<1x128xf32, #tpu.memory_space<vmem>>, vector<1x128xf32>
    %4 = vector.broadcast %3 : vector<1x128xf32> to vector<16x128xf32>
    %5 = arith.addf %2, %4 : vector<16x128xf32>
    %cst_5 = arith.constant 2.000000e+01 : f32
    %6 = vector.broadcast %cst_5 : f32 to vector<16x128xf32>
    %7 = arith.minimumf %5, %6 : vector<16x128xf32>
    %8 = math.exp %7 : vector<16x128xf32>
    %cst_6 = arith.constant 2.000000e+00 : f32
    %9 = vector.broadcast %cst_6 : f32 to vector<16x128xf32>
    %10 = arith.addf %8, %9 : vector<16x128xf32>
    %11 = arith.mulf %8, %10 : vector<16x128xf32>
    %12 = arith.mulf %5, %11 : vector<16x128xf32>
    %cst_7 = arith.constant 2.000000e+00 : f32
    %13 = vector.broadcast %cst_7 : f32 to vector<16x128xf32>
    %14 = arith.addf %11, %13 : vector<16x128xf32>
    %15 = tpu.reciprocal %14 {approx = true} : vector<16x128xf32> -> vector<16x128xf32>
    %16 = arith.mulf %12, %15 : vector<16x128xf32>
    %17 = arith.truncf %16 : vector<16x128xf32> to vector<16x128xbf16>
    %c0_8 = arith.constant 0 : index
    %c0_9 = arith.constant 0 : index
    %18 = vector.load %arg4[%c0_8, %c0_9] : memref<128x64xbf16, #tpu.memory_space<vmem>>, vector<128x64xbf16>
    %cst_10 = arith.constant dense<0.000000e+00> : vector<16x64xf32>
    %19 = tpu.matmul %17, %18, %cst_10 {dimension_numbers = #tpu.dot_dimension_numbers<[1], [0], [0], [1], [0, 0, 1, 1], [], []>} : vector<16x128xbf16>, vector<128x64xbf16>, vector<16x64xf32> -> vector<16x64xf32>
    %c0_11 = arith.constant 0 : index
    %c0_12 = arith.constant 0 : index
    %20 = vector.load %arg5[%c0_11, %c0_12] : memref<1x64xf32, #tpu.memory_space<vmem>>, vector<1x64xf32>
    %21 = vector.broadcast %20 : vector<1x64xf32> to vector<16x64xf32>
    %22 = arith.addf %19, %21 : vector<16x64xf32>
    %cst_13 = arith.constant 2.000000e+01 : f32
    %23 = vector.broadcast %cst_13 : f32 to vector<16x64xf32>
    %24 = arith.minimumf %22, %23 : vector<16x64xf32>
    %25 = math.exp %24 : vector<16x64xf32>
    %cst_14 = arith.constant 2.000000e+00 : f32
    %26 = vector.broadcast %cst_14 : f32 to vector<16x64xf32>
    %27 = arith.addf %25, %26 : vector<16x64xf32>
    %28 = arith.mulf %25, %27 : vector<16x64xf32>
    %29 = arith.mulf %22, %28 : vector<16x64xf32>
    %cst_15 = arith.constant 2.000000e+00 : f32
    %30 = vector.broadcast %cst_15 : f32 to vector<16x64xf32>
    %31 = arith.addf %28, %30 : vector<16x64xf32>
    %32 = tpu.reciprocal %31 {approx = true} : vector<16x64xf32> -> vector<16x64xf32>
    %33 = arith.mulf %29, %32 : vector<16x64xf32>
    %34 = arith.truncf %33 : vector<16x64xf32> to vector<16x64xbf16>
    %c0_16 = arith.constant 0 : index
    %c0_17 = arith.constant 0 : index
    %35 = vector.load %arg6[%c0_16, %c0_17] : memref<64x32xbf16, #tpu.memory_space<vmem>>, vector<64x32xbf16>
    %cst_18 = arith.constant dense<0.000000e+00> : vector<16x32xf32>
    %36 = tpu.matmul %34, %35, %cst_18 {dimension_numbers = #tpu.dot_dimension_numbers<[1], [0], [0], [1], [0, 0, 1, 1], [], []>} : vector<16x64xbf16>, vector<64x32xbf16>, vector<16x32xf32> -> vector<16x32xf32>
    %c0_19 = arith.constant 0 : index
    %c0_20 = arith.constant 0 : index
    %37 = vector.load %arg7[%c0_19, %c0_20] : memref<1x32xf32, #tpu.memory_space<vmem>>, vector<1x32xf32>
    %38 = vector.broadcast %37 : vector<1x32xf32> to vector<16x32xf32>
    %39 = arith.addf %36, %38 : vector<16x32xf32>
    %cst_21 = arith.constant 2.000000e+01 : f32
    %40 = vector.broadcast %cst_21 : f32 to vector<16x32xf32>
    %41 = arith.minimumf %39, %40 : vector<16x32xf32>
    %42 = math.exp %41 : vector<16x32xf32>
    %cst_22 = arith.constant 2.000000e+00 : f32
    %43 = vector.broadcast %cst_22 : f32 to vector<16x32xf32>
    %44 = arith.addf %42, %43 : vector<16x32xf32>
    %45 = arith.mulf %42, %44 : vector<16x32xf32>
    %46 = arith.mulf %39, %45 : vector<16x32xf32>
    %cst_23 = arith.constant 2.000000e+00 : f32
    %47 = vector.broadcast %cst_23 : f32 to vector<16x32xf32>
    %48 = arith.addf %45, %47 : vector<16x32xf32>
    %49 = tpu.reciprocal %48 {approx = true} : vector<16x32xf32> -> vector<16x32xf32>
    %50 = arith.mulf %46, %49 : vector<16x32xf32>
    %51 = arith.truncf %50 : vector<16x32xf32> to vector<16x32xbf16>
    %c0_24 = arith.constant 0 : index
    %c0_25 = arith.constant 0 : index
    %52 = vector.load %arg8[%c0_24, %c0_25] : memref<32x8xbf16, #tpu.memory_space<vmem>>, vector<32x8xbf16>
    %cst_26 = arith.constant dense<0.000000e+00> : vector<16x8xf32>
    %53 = tpu.matmul %51, %52, %cst_26 {dimension_numbers = #tpu.dot_dimension_numbers<[1], [0], [0], [1], [0, 0, 1, 1], [], []>} : vector<16x32xbf16>, vector<32x8xbf16>, vector<16x8xf32> -> vector<16x8xf32>
    %c0_27 = arith.constant 0 : index
    %c0_28 = arith.constant 0 : index
    %54 = vector.load %arg9[%c0_27, %c0_28] : memref<1x8xf32, #tpu.memory_space<vmem>>, vector<1x8xf32>
    %55 = vector.broadcast %54 : vector<1x8xf32> to vector<16x8xf32>
    %56 = arith.addf %53, %55 : vector<16x8xf32>
    %57 = math.tanh %56 : vector<16x8xf32>
    %c0_29 = arith.constant 0 : index
    %c0_30 = arith.constant 0 : index
    %58 = vector.load %arg10[%c0_29, %c0_30] : memref<16x8xf32, #tpu.memory_space<vmem>>, vector<16x8xf32>
    tpu.vector_store %arg10[%c0_29, %c0_30], %57 {strides = array<i32>} : memref<16x8xf32, #tpu.memory_space<vmem>>, vector<16x8xf32>,
    return
  }
  func.func @transform_0(%arg0: i32) -> (i32, i32) {
    %c0_i32 = arith.constant 0 : i32
    %c0_i32_0 = arith.constant 0 : i32
    return %arg0, %c0_i32 : i32, i32
  }
  func.func @transform_1(%arg0: i32) -> (i32, i32) {
    %c0_i32 = arith.constant 0 : i32
    %c0_i32_0 = arith.constant 0 : i32
    %c0_i32_1 = arith.constant 0 : i32
    return %c0_i32, %c0_i32_0 : i32, i32
  }
  func.func @transform_2(%arg0: i32) -> (i32, i32) {
    %c0_i32 = arith.constant 0 : i32
    %c0_i32_0 = arith.constant 0 : i32
    %c0_i32_1 = arith.constant 0 : i32
    return %c0_i32, %c0_i32_0 : i32, i32
  }
  func.func @transform_3(%arg0: i32) -> (i32, i32) {
    %c0_i32 = arith.constant 0 : i32
    %c0_i32_0 = arith.constant 0 : i32
    %c0_i32_1 = arith.constant 0 : i32
    return %c0_i32, %c0_i32_0 : i32, i32
  }
  func.func @transform_4(%arg0: i32) -> (i32, i32) {
    %c0_i32 = arith.constant 0 : i32
    %c0_i32_0 = arith.constant 0 : i32
    %c0_i32_1 = arith.constant 0 : i32
    return %c0_i32, %c0_i32_0 : i32, i32
  }
  func.func @transform_5(%arg0: i32) -> (i32, i32) {
    %c0_i32 = arith.constant 0 : i32
    %c0_i32_0 = arith.constant 0 : i32
    %c0_i32_1 = arith.constant 0 : i32
    return %c0_i32, %c0_i32_0 : i32, i32
  }
  func.func @transform_6(%arg0: i32) -> (i32, i32) {
    %c0_i32 = arith.constant 0 : i32
    %c0_i32_0 = arith.constant 0 : i32
    %c0_i32_1 = arith.constant 0 : i32
    return %c0_i32, %c0_i32_0 : i32, i32
  }
  func.func @transform_7(%arg0: i32) -> (i32, i32) {
    %c0_i32 = arith.constant 0 : i32
    %c0_i32_0 = arith.constant 0 : i32
    %c0_i32_1 = arith.constant 0 : i32
    return %c0_i32, %c0_i32_0 : i32, i32
  }
  func.func @transform_8(%arg0: i32) -> (i32, i32) {
    %c0_i32 = arith.constant 0 : i32
    %c0_i32_0 = arith.constant 0 : i32
    %c0_i32_1 = arith.constant 0 : i32
    return %c0_i32, %c0_i32_0 : i32, i32
  }
  func.func @transform_9(%arg0: i32) -> (i32, i32) {
    %c0_i32 = arith.constant 0 : i32
    %c0_i32_0 = arith.constant 0 : i32
    return %arg0, %c0_i32 : i32, i32
  }
}

</mosaic_0001>

<bundles_post_ra>
// kernel: armynet_forward.1
= control target key start
LH: loop header
LB: loop body
LE: loop exit
PB: predicated region body
PF: predicated region fallthrough
CT: control target
= control target key end

     0   :  { %vm90_vm0 = vcmask 1046528   ;;  %v619_v0 = vmov 0.0   ;;  %vm620_vm1 = vmmov 0   ;;  %vm86_vm2 = vcmask 637952   ;;  %s776_s1 = inlined_call_operand.vmem [shape: bf16[78,128], index: 1, kind: input, shape index: {}]   ;;  %s777_s0 = inlined_call_operand.vmem [shape: bf16[16,78], index: 0, kind: input, shape index: {}]   ;;  %s778_s3 = inlined_call_operand.vmem [shape: bf16[128,64], index: 3, kind: input, shape index: {}]   ;;  %s779_s2 = inlined_call_operand.vmem [shape: f32[1,128], index: 2, kind: input, shape index: {}]   ;;  %s780_s5 = inlined_call_operand.vmem [shape: bf16[64,32], index: 5, kind: input, shape index: {}]   ;;  %s781_s4 = inlined_call_operand.vmem [shape: f32[1,64], index: 4, kind: input, shape index: {}]   ;;  %s782_s7 = inlined_call_operand.vmem [shape: bf16[32,8], index: 7, kind: input, shape index: {}]   ;;  %s783_s6 = inlined_call_operand.vmem [shape: f32[1,32], index: 6, kind: input, shape index: {}]   ;;  %s784_s8 = inlined_call_operand.vmem [shape: f32[1,8], index: 8, kind: input, shape index: {}]   ;;  %s785_s9 = inlined_call_operand.vmem [shape: f32[16,8], index: 9, kind: output, shape index: {}]  }
   0x1   :  { %515 = vmatprep.subr.bf16.mxu0 %v619_v0  ;;  %v571_v1 = vld [vmem:[%s776_s1 + $0x20] sm:$0x7f]   ;;  %525 = vmatprep.mubr.msk.bf16.mxu0 %vm620_vm1, %v619_v0  ;;  %v572_v3 = vld [vmem:[%s776_s1 + $0x18] sm:$0xff]   ;;  %v573_v4 = vld [vmem:[%s776_s1 + $0x10] sm:$0xff]   ;;  %vm324_vm3 = vcmask 523264   ;;  %vm411_vm4 = vcmask 261120  }
   0x2   :  { %529 = vmatprep.subr.bf16.mxu1 %v619_v0  ;;  %545 = vmatprep.mubr.msk.bf16.mxu1 %vm620_vm1, %v619_v0  ;;  %v92_v2 = vsel %vm90_vm0, %v571_v1, 0  ;;  %v574_v5 = vld [vmem:[%s776_s1 + $0x8] sm:$0xff]   ;;  %v575_v6 = vld [vmem:[%s776_s1] sm:$0xff]   ;;  %v577_v8 = vld [vmem:[%s778_s3 + $0x38] sm:$0xff]   ;;  %vm458_vm5 = vcmask 64512  }
   0x3   :  { %516 = vmatpush3.bf16.msra.mxu0 %v92_v2  ;;  %v576_v7 = vld [vmem:[%s777_s0] sm:$0xff]   ;;  %530 = vmatpush3.bf16.msra.mxu1 %v577_v8  ;;  %v578_v9 = vld [vmem:[%s778_s3 + $0x30] sm:$0xff]   ;;  %v579_v10 = vld [vmem:[%s778_s3 + $0x28] sm:$0xff]  }
   0x4   :  { %517 = vmatprep.subr.bf16.mxu0 %v619_v0  ;;  %531 = vmatprep.subr.bf16.mxu1 %v619_v0  ;;  %v580_v11 = vld [vmem:[%s778_s3 + $0x20] sm:$0xff]   ;;  %v581_v12 = vld [vmem:[%s778_s3 + $0x18] sm:$0xff]   ;;  %v582_v13 = vld [vmem:[%s778_s3 + $0x10] sm:$0xff]  }
   0x5   :  { %v583_v14 = vld [vmem:[%s778_s3 + $0x8] sm:$0xff]   ;;  %v584_v15 = vld [vmem:[%s778_s3] sm:$0xff]   ;;  %v585_v42 = vld [vmem:[%s780_s5 + $0x18] sm:$0xff]  }
   0x6   :  { %v465_v16 = vld [vmem:[%s779_s2] ss:$0 sm:$0xff]  ;;  %v586_v43 = vld [vmem:[%s780_s5 + $0x10] sm:$0xff]   ;;  %v587_v44 = vld [vmem:[%s780_s5 + $0x8] sm:$0xff]  }
   0x7   :  { %518 = vmatpush3.bf16.msra.mxu0 %v572_v3  ;;  %532 = vmatpush3.bf16.msra.mxu1 %v578_v9  ;;  %v588_v45 = vld [vmem:[%s780_s5] sm:$0xff]   ;;  %v589_v9 = vld [vmem:[%s782_s7 + $0x8] sm:$0xff]  }
   0x8   :  { %519 = vmatprep.subr.bf16.mxu0 %v619_v0  ;;  %533 = vmatprep.subr.bf16.mxu1 %v619_v0  ;;  %v473_v46 = vld [vmem:[%s781_s4] ss:$0 sm:$0xff] }
   0xb   :  { %520 = vmatpush3.bf16.msra.mxu0 %v573_v4  ;;  %534 = vmatpush3.bf16.msra.mxu1 %v579_v10  ;;  %v590_v10 = vld [vmem:[%s782_s7] sm:$0xff]  }
   0xc   :  { %521 = vmatprep.subr.bf16.mxu0 %v619_v0  ;;  %535 = vmatprep.subr.bf16.mxu1 %v619_v0 }
   0xf   :  { %522 = vmatpush3.bf16.msra.mxu0 %v574_v5  ;;  %536 = vmatpush3.bf16.msra.mxu1 %v580_v11  ;;  %v482_v11 = vld [vmem:[%s783_s6] ss:$0 sm:$0xff] }
  0x10   :  { %523 = vmatprep.subr.bf16.mxu0 %v619_v0  ;;  %537 = vmatprep.subr.bf16.mxu1 %v619_v0 }
  0x13   :  { %524 = vmatpush3.bf16.msra.mxu0 %v575_v6  ;;  %538 = vmatpush3.bf16.msra.mxu1 %v581_v12 }
  0x14   :  { %549 = vmatprep.subr.bf16.mxu0 %v619_v0  ;;  %539 = vmatprep.subr.bf16.mxu1 %v619_v0 }
  0x16   :  { %526 = vmatmul.mubr.msk.bf16.vlgmr.msra.gmra.mxu0 %vm86_vm2, %v576_v7 }
  0x17   :  { %557 = vmatprep.mubr.msk.bf16.mxu0 %vm620_vm1, %v619_v0  ;;  %540 = vmatpush3.bf16.msra.mxu1 %v582_v13 }
  0x18   :  { %541 = vmatprep.subr.bf16.mxu1 %v619_v0  ;;  %550 = vmatpush3.bf16.msra.mxu0 %v585_v42 }
  0x19   :  { %551 = vmatprep.subr.bf16.mxu0 %v619_v0 }
  0x1b   :  { %542 = vmatpush3.bf16.msra.mxu1 %v583_v14 }
  0x1c   :  { %543 = vmatprep.subr.bf16.mxu1 %v619_v0  ;;  %552 = vmatpush3.bf16.msra.mxu0 %v586_v43 }
  0x1d   :  { %553 = vmatprep.subr.bf16.mxu0 %v619_v0 }
  0x1f   :  { %544 = vmatpush3.bf16.msra.mxu1 %v584_v15 }
  0x20   :  { %561 = vmatprep.subr.bf16.mxu1 %v619_v0  ;;  %554 = vmatpush3.bf16.msra.mxu0 %v587_v44 }
  0x21   :  { %555 = vmatprep.subr.bf16.mxu0 %v619_v0 }
  0x24   :  { %556 = vmatpush3.bf16.msra.mxu0 %v588_v45 }
  0xd6   :  { %v128_v17 = vpop.f32.mrf.mxu0 }
  0xd7   :  { %v129_v18 = vadd.f32 %v465_v16, %v128_v17 }
  0xd8   :  { %v527_v19 = vpop.f32.mrf.mxu0 }
  0xd9   :  { %v135_v20 = vmin.f32 %v129_v18, 20.0 }
  0xda   :  { %v131_v21 = vpop.f32.mrf.mxu0 }
  0xdb   :  { %v137_v22 = vmul.f32 1.442695, %v135_v20  ;;  %v132_v23 = vadd.f32 %v465_v16, %v131_v21 }
  0xdc   :  { %v528_v24 = vpop.f32.mrf.mxu0 }
  0xdd   :  { %591 = vpow2.f32 %v137_v22  ;;  %v136_v25 = vmin.f32 %v132_v23, 20.0 }
  0xdf   :  { %v139_v26 = vmul.f32 1.442695, %v136_v25 }
  0xe1   :  { %593 = vpow2.f32 %v139_v26 }
  0xea   :  { %v592_v27 = vpop.eup %591 }
  0xeb   :  { %v141_v28 = vadd.f32 2.0, %v592_v27 }
  0xed   :  { %v143_v29 = vmul.f32 %v592_v27, %v141_v28 }
  0xee   :  { %v594_v30 = vpop.eup %593 }
  0xef   :  { %v147_v31 = vadd.f32 2.0, %v143_v29  ;;  %v142_v32 = vadd.f32 2.0, %v594_v30  ;;  %v145_v36 = vmul.f32 %v143_v29, %v129_v18 }
  0xf1   :  { %v144_v33 = vmul.f32 %v594_v30, %v142_v32  ;;  %595 = vrcp.f32 %v147_v31 }
  0xf3   :  { %v148_v34 = vadd.f32 2.0, %v144_v33  ;;  %v146_v37 = vmul.f32 %v144_v33, %v132_v23 }
  0xf5   :  { %597 = vrcp.f32 %v148_v34 }
  0xfe   :  { %v596_v35 = vpop.eup %595 }
  0xff   :  { %v151_v39 = vmul.f32 %v596_v35, %v145_v36  ;;  %v488_v36 = vld [vmem:[%s784_s8] ss:$0 sm:$0xff] }
 0x102   :  { %v598_v38 = vpop.eup %597 }
 0x103   :  { %v152_v40 = vmul.f32 %v598_v38, %v146_v37 }
 0x105   :  { %v153_v41 = vpack.c.bf16 %v152_v40, %v151_v39 }
 0x107   :  { %546 = vmatmul.mubr.bf16.vlgmr.msra.gmra.mxu1 %v153_v41 }
 0x108   :  { %565 = vmatprep.mubr.msk.bf16.mxu1 %vm620_vm1, %v619_v0  ;;  %562 = vmatpush3.bf16.msra.mxu1 %v589_v9 }
 0x109   :  { %563 = vmatprep.subr.bf16.mxu1 %v619_v0 }
 0x10c   :  { %564 = vmatpush3.bf16.msra.mxu1 %v590_v10 }
 0x1c7   :  { %v259_v47 = vpop.f32.mrf.mxu1 }
 0x1c8   :  { %v260_v48 = vadd.f32 %v473_v46, %v259_v47 }
 0x1c9   :  { %v547_v49 = vpop.f32.mrf.mxu1 }
 0x1ca   :  { %v266_v50 = vmin.f32 %v260_v48, 20.0 }
 0x1cb   :  { %v262_v51 = vpop.f32.mrf.mxu1 }
 0x1cc   :  { %v268_v52 = vmul.f32 1.442695, %v266_v50  ;;  %v263_v53 = vadd.f32 %v473_v46, %v262_v51 }
 0x1cd   :  { %v548_v54 = vpop.f32.mrf.mxu1 }
 0x1ce   :  { %599 = vpow2.f32 %v268_v52  ;;  %v267_v55 = vmin.f32 %v263_v53, 20.0 }
 0x1d0   :  { %v270_v56 = vmul.f32 1.442695, %v267_v55 }
 0x1d2   :  { %601 = vpow2.f32 %v270_v56 }
 0x1db   :  { %v600_v57 = vpop.eup %599 }
 0x1dc   :  { %v272_v58 = vadd.f32 2.0, %v600_v57 }
 0x1de   :  { %v274_v59 = vmul.f32 %v600_v57, %v272_v58 }
 0x1df   :  { %v602_v60 = vpop.eup %601 }
 0x1e0   :  { %v278_v61 = vadd.f32 2.0, %v274_v59  ;;  %v273_v62 = vadd.f32 2.0, %v602_v60  ;;  %v276_v3 = vmul.f32 %v274_v59, %v260_v48 }
 0x1e2   :  { %v275_v63 = vmul.f32 %v602_v60, %v273_v62  ;;  %603 = vrcp.f32 %v278_v61 }
 0x1e4   :  { %v279_v1 = vadd.f32 2.0, %v275_v63  ;;  %v277_v4 = vmul.f32 %v275_v63, %v263_v53 }
 0x1e6   :  { %605 = vrcp.f32 %v279_v1 }
 0x1ef   :  { %v604_v2 = vpop.eup %603 }
 0x1f0   :  { %v282_v6 = vmul.f32 %v604_v2, %v276_v3 }
 0x1f3   :  { %v606_v5 = vpop.eup %605 }
 0x1f4   :  { %v283_v7 = vmul.f32 %v606_v5, %v277_v4 }
 0x1f6   :  { %v284_v8 = vpack.c.bf16 %v283_v7, %v282_v6 }
 0x1f8   :  { %558 = vmatmul.mubr.msk.bf16.vlgmr.msra.gmra.mxu0 %vm324_vm3, %v284_v8 }
 0x2b8   :  { %v362_v12 = vpop.f32.mrf.mxu0 }
 0x2b9   :  { %v363_v13 = vadd.f32 %v482_v11, %v362_v12 }
 0x2ba   :  { %v559_v14 = vpop.f32.mrf.mxu0 }
 0x2bb   :  { %v369_v15 = vmin.f32 %v363_v13, 20.0 }
 0x2bc   :  { %v365_v16 = vpop.f32.mrf.mxu0 }
 0x2bd   :  { %v371_v17 = vmul.f32 1.442695, %v369_v15  ;;  %v366_v18 = vadd.f32 %v482_v11, %v365_v16 }
 0x2be   :  { %v560_v19 = vpop.f32.mrf.mxu0 }
 0x2bf   :  { %607 = vpow2.f32 %v371_v17  ;;  %v370_v20 = vmin.f32 %v366_v18, 20.0 }
 0x2c1   :  { %v373_v0 = vmul.f32 1.442695, %v370_v20 }
 0x2c3   :  { %609 = vpow2.f32 %v373_v0 }
 0x2cc   :  { %v608_v21 = vpop.eup %607 }
 0x2cd   :  { %v375_v22 = vadd.f32 2.0, %v608_v21 }
 0x2cf   :  { %v377_v23 = vmul.f32 %v608_v21, %v375_v22 }
 0x2d0   :  { %v610_v24 = vpop.eup %609 }
 0x2d1   :  { %v381_v25 = vadd.f32 2.0, %v377_v23  ;;  %v376_v26 = vadd.f32 2.0, %v610_v24  ;;  %v379_v30 = vmul.f32 %v377_v23, %v363_v13 }
 0x2d3   :  { %v378_v27 = vmul.f32 %v610_v24, %v376_v26  ;;  %611 = vrcp.f32 %v381_v25 }
 0x2d5   :  { %v382_v28 = vadd.f32 2.0, %v378_v27  ;;  %v380_v31 = vmul.f32 %v378_v27, %v366_v18 }
 0x2d7   :  { %613 = vrcp.f32 %v382_v28 }
 0x2e0   :  { %v612_v29 = vpop.eup %611 }
 0x2e1   :  { %v385_v33 = vmul.f32 %v612_v29, %v379_v30 }
 0x2e4   :  { %v614_v32 = vpop.eup %613 }
 0x2e5   :  { %v386_v34 = vmul.f32 %v614_v32, %v380_v31 }
 0x2e7   :  { %v387_v35 = vpack.c.bf16 %v386_v34, %v385_v33 }
 0x2e9   :  { %566 = vmatmul.mubr.msk.bf16.vlgmr.msra.gmra.mxu1 %vm411_vm4, %v387_v35 }
 0x3a9   :  { %v449_v37 = vpop.f32.mrf.mxu1 }
 0x3aa   :  { %v450_v38 = vadd.f32 %v488_v36, %v449_v37 }
 0x3ab   :  { %v567_v39 = vpop.f32.mrf.mxu1 }
 0x3ac   :  { %615 = vtanh.f32 %v450_v38 }
 0x3ad   :  { %v452_v40 = vpop.f32.mrf.mxu1 }
 0x3ae   :  { %v453_v41 = vadd.f32 %v488_v36, %v452_v40 }
 0x3af   :  { %v568_v42 = vpop.f32.mrf.mxu1 }
 0x3b0   :  { %617 = vtanh.f32 %v453_v41 }
 0x3b9   :  { %v616_v43 = vpop.eup %615 }
 0x3ba   :  { %459 = vst.msk [vmem:[%s785_s9] sm:$0xff] %vm458_vm5, %v616_v43 }
 0x3bd   :  { %v618_v44 = vpop.eup %617 }
 0x3be   :  { %460 = vst.msk [vmem:[%s785_s9 + $0x8] sm:$0xff] %vm458_vm5, %v618_v44 }

</bundles_post_ra>
